<compile_context>
chip_gen: v5e
topology: v5e:2x2
jax: 0.10.0
libtpu: 0.0.40
codegen_flags: <defaults>
</compile_context>

<pallas_src>
import jax
import jax.numpy as jnp
from jax.experimental import pallas as pl
from jax.experimental.pallas import tpu as pltpu

NEG_SLOPE = 0.01                      # F.leaky_relu default
MAX_TILE = 32768                      # rows per grid step (lane axis), multiple of 128
VMEM_LIMIT_BYTES = 32 * 1024 * 1024   # > v5e's 16 MiB scoped default, < v7x's 64 MiB total


def _leaky_relu(x):
    # slope < 1  =>  max(x, slope*x) == leaky_relu(x)
    return jnp.maximum(x, NEG_SLOPE * x)


def _round_up(n, m):
    return ((n + m - 1) // m) * m


def _choose_tile(n):
    """Rows per grid step: big enough to amortize per-step overhead, >=2 tiles
    for n > 128 so both v7x TensorCores get work, lane axis multiple of 128."""
    if n <= 128:
        return n                                   # single full block (block dim == array dim)
    half = _round_up((n + 1) // 2, 128)
    return min(MAX_TILE, half)


def _ae_kernel(
    x_ref,                 # (2, T)   input tile, feature-major, f32
    w1_ref, b1_ref,        # (32, 2) f32   (32, 1) f32
    w2_ref, b2_ref,        # (32, 32) bf16 (32, 1) f32
    w3_ref, b3_ref,        # (b1+b2, 32) bf16 (b1+b2, 1) f32   fused enc3_1|enc3_2
    wd1_ref, bd1_ref,      # (32, b1+b2) bf16 (32, 1) f32
    wd2_ref, bd2_ref,      # (32, 32) bf16 (32, 1) f32
    wd3_ref, bd3_ref,      # (4, 32) bf16  (4, 1) f32
    out_ref,               # (4, T) f32
):
    x = x_ref[...]                                                     # (2, T) f32

    # enc1 (K=2): VPU broadcast-FMAs in f32 -- keeps the tiny-K matmul off the
    # MXU-push slot and keeps the first layer full precision.
    h = _leaky_relu(
        w1_ref[:, 0:1] * x[0:1, :] + w1_ref[:, 1:2] * x[1:2, :] + b1_ref[...]
    )                                                                  # (32, T) f32

    def mm(w_ref, act, b_ref):
        # bf16 operands, f32 accumulation.
        return jnp.dot(w_ref[...], act.astype(jnp.bfloat16),
                       preferred_element_type=jnp.float32) + b_ref[...]

    # enc2 (+ dropout == identity in eval)
    h = _leaky_relu(mm(w2_ref, h, b2_ref))                             # (32, T)
    # enc3_1 | enc3_2 fused -> latent z = [z1; z2]
    z = _leaky_relu(mm(w3_ref, h, b3_ref))                             # (b1+b2, T)
    # dec1 (consumes the fused latent directly)
    d = _leaky_relu(mm(wd1_ref, z, bd1_ref))                           # (32, T)
    # dec2
    d = _leaky_relu(mm(wd2_ref, d, bd2_ref))                           # (32, T)
    # dec3 (no activation)
    out = mm(wd3_ref, d, bd3_ref)                                      # (4, T)

    out_ref[...] = out.astype(out_ref.dtype)


def _const_spec(shape):
    # Tiny full-block array, resident in VMEM for every grid step.
    return pl.BlockSpec(shape, lambda i: (0, 0))


@jax.jit
def autoencoder_breast_v0_3_forward(x, params):
    """x: (B, S, 2) float32.  params: PyTorch-layout weights (out,in) & biases (out,1)."""
    B, S, F_in = x.shape
    assert F_in == 2
    N = B * S

    tile = _choose_tile(N)
    num_tiles = pl.cdiv(N, tile)       # partial last block masked by Pallas; no pad pass

    # Feature-major ("lane-dense") layout: rows ride the 128-lane axis.
    xT = jnp.transpose(x.reshape(N, F_in).astype(jnp.float32))         # (2, N)

    # Fuse enc3_1 / enc3_2 along the output-feature axis (exact: LeakyReLU is
    # elementwise), matching torch.cat((z1, z2), dim=2) ordering.
    w3 = jnp.concatenate([params["enc3_1_w"], params["enc3_2_w"]], axis=0)
    b3 = jnp.concatenate([params["enc3_1_b"], params["enc3_2_b"]], axis=0)

    bf16 = jnp.bfloat16
    f32 = jnp.float32
    weight_args = (
        params["enc1_w"].astype(f32), params["enc1_b"].astype(f32),    # enc1 stays f32 (VPU FMA)
        params["enc2_w"].astype(bf16), params["enc2_b"].astype(f32),
        w3.astype(bf16), b3.astype(f32),
        params["dec1_w"].astype(bf16), params["dec1_b"].astype(f32),
        params["dec2_w"].astype(bf16), params["dec2_b"].astype(f32),
        params["dec3_w"].astype(bf16), params["dec3_b"].astype(f32),
    )

    latent = w3.shape[0]
    flops_per_row = 2 * (2 * 32 + 32 * 32 + 32 * latent + latent * 32 + 32 * 32 + 32 * 4)
    weight_bytes = sum(int(a.size) * a.dtype.itemsize for a in weight_args)
    cost = pl.CostEstimate(
        flops=flops_per_row * N,
        transcendentals=0,
        bytes_accessed=N * (2 * 4 + 4 * 4) + weight_bytes,
    )

    outT = pl.pallas_call(
        _ae_kernel,
        out_shape=jax.ShapeDtypeStruct((4, N), jnp.float32),
        grid=(num_tiles,),
        in_specs=[pl.BlockSpec((2, tile), lambda i: (0, i))]
        + [_const_spec(a.shape) for a in weight_args],
        out_specs=pl.BlockSpec((4, tile), lambda i: (0, i)),
        compiler_params=pltpu.CompilerParams(
            dimension_semantics=("parallel",),
            vmem_limit_bytes=VMEM_LIMIT_BYTES,
        ),
        cost_estimate=cost,
    )(xT, *weight_args)

    return jnp.transpose(outT).reshape(B, S, 4)


def init_params(key, b1=4, b2=4):
    """Deterministic synthetic parameters in PyTorch layout: W=(out,in), b=(out,1)."""
    dims = {
        "enc1": (2, 32),
        "enc2": (32, 32),
        "enc3_1": (32, b1),
        "enc3_2": (32, b2),
        "dec1": (b1 + b2, 32),
        "dec2": (32, 32),
        "dec3": (32, 4),
    }
    params = {}
    keys = jax.random.split(key, 2 * len(dims))
    for i, (name, (fin, fout)) in enumerate(dims.items()):
        bound = 1.0 / jnp.sqrt(fin)
        params[f"{name}_w"] = jax.random.uniform(
            keys[2 * i], (fout, fin), jnp.float32, -bound, bound
        )
        params[f"{name}_b"] = jax.random.uniform(
            keys[2 * i + 1], (fout, 1), jnp.float32, -bound, bound
        )
    return params


def _reference_forward(x, params):
    """Pure-JAX f32 reference matching the PyTorch module (eval mode)."""
    def lin(h, name):
        return h @ params[f"{name}_w"].T + params[f"{name}_b"][:, 0]

    h = _leaky_relu(lin(x, "enc1"))
    h = _leaky_relu(lin(h, "enc2"))          # dropout == identity in eval
    z1 = _leaky_relu(lin(h, "enc3_1"))
    z2 = _leaky_relu(lin(h, "enc3_2"))
    z = jnp.concatenate([z1, z2], axis=2)
    d = _leaky_relu(lin(z, "dec1"))
    d = _leaky_relu(lin(d, "dec2"))
    return lin(d, "dec3")


if __name__ == "__main__":
    key = jax.random.PRNGKey(0)
    k_param, k_x = jax.random.split(key)

    B, S = 2, 8  # input features fixed at 2 by the module (enc1: Linear(2, 32))
    x = jax.random.normal(k_x, (B, S, 2), dtype=jnp.float32)

    params = init_params(k_param, b1=4, b2=4)

    out = autoencoder_breast_v0_3_forward(x, params)
    jax.block_until_ready(out)

    assert out.shape == (B, S, 4), out.shape
    assert jnp.all(jnp.isfinite(out))

    ref = _reference_forward(x, params)
    # Tolerance loosened vs. the pure-f32 version because the inner matmuls now
    # use bf16 operands (f32 accumulation).
    assert jnp.allclose(out, ref, atol=2e-2, rtol=2e-2), float(
        jnp.max(jnp.abs(out - ref))
    )
    print("KERNEL_OK")
</pallas_src>

<mosaic_0001>
module attributes {stable_mosaic.version = 11 : i64} {
  func.func @_ae_kernel(%arg0: i32, %arg1: memref<2x16xf32, #tpu.memory_space<vmem>>, %arg2: memref<32x2xf32, #tpu.memory_space<vmem>>, %arg3: memref<32x1xf32, #tpu.memory_space<vmem>>, %arg4: memref<32x32xbf16, #tpu.memory_space<vmem>>, %arg5: memref<32x1xf32, #tpu.memory_space<vmem>>, %arg6: memref<8x32xbf16, #tpu.memory_space<vmem>>, %arg7: memref<8x1xf32, #tpu.memory_space<vmem>>, %arg8: memref<32x8xbf16, #tpu.memory_space<vmem>>, %arg9: memref<32x1xf32, #tpu.memory_space<vmem>>, %arg10: memref<32x32xbf16, #tpu.memory_space<vmem>>, %arg11: memref<32x1xf32, #tpu.memory_space<vmem>>, %arg12: memref<4x32xbf16, #tpu.memory_space<vmem>>, %arg13: memref<4x1xf32, #tpu.memory_space<vmem>>, %arg14: memref<4x16xf32, #tpu.memory_space<vmem>>) attributes {dimension_semantics = [#tpu.dimension_semantics<parallel>], iteration_bounds = array<i64: 1>, scalar_prefetch = 0 : i64, scratch_operands = 0 : i64, tpu.core_type = #tpu.core_type<tc>, window_params = [{transform_indices = @transform_0, window_bounds = array<i64: 2, 16>}, {pipeline_mode = #tpu.pipeline_mode<synchronous>, transform_indices = @transform_1, window_bounds = array<i64: 32, 2>}, {pipeline_mode = #tpu.pipeline_mode<synchronous>, transform_indices = @transform_2, window_bounds = array<i64: 32, 1>}, {pipeline_mode = #tpu.pipeline_mode<synchronous>, transform_indices = @transform_3, window_bounds = array<i64: 32, 32>}, {pipeline_mode = #tpu.pipeline_mode<synchronous>, transform_indices = @transform_4, window_bounds = array<i64: 32, 1>}, {pipeline_mode = #tpu.pipeline_mode<synchronous>, transform_indices = @transform_5, window_bounds = array<i64: 8, 32>}, {pipeline_mode = #tpu.pipeline_mode<synchronous>, transform_indices = @transform_6, window_bounds = array<i64: 8, 1>}, {pipeline_mode = #tpu.pipeline_mode<synchronous>, transform_indices = @transform_7, window_bounds = array<i64: 32, 8>}, {pipeline_mode = #tpu.pipeline_mode<synchronous>, transform_indices = @transform_8, window_bounds = array<i64: 32, 1>}, {pipeline_mode = #tpu.pipeline_mode<synchronous>, transform_indices = @transform_9, window_bounds = array<i64: 32, 32>}, {pipeline_mode = #tpu.pipeline_mode<synchronous>, transform_indices = @transform_10, window_bounds = array<i64: 32, 1>}, {pipeline_mode = #tpu.pipeline_mode<synchronous>, transform_indices = @transform_11, window_bounds = array<i64: 4, 32>}, {pipeline_mode = #tpu.pipeline_mode<synchronous>, transform_indices = @transform_12, window_bounds = array<i64: 4, 1>}, {transform_indices = @transform_13, window_bounds = array<i64: 4, 16>}]} {
    %c0 = arith.constant 0 : index
    %c0_0 = arith.constant 0 : index
    %0 = vector.load %arg1[%c0, %c0_0] : memref<2x16xf32, #tpu.memory_space<vmem>>, vector<2x16xf32>
    %c0_1 = arith.constant 0 : index
    %c0_2 = arith.constant 0 : index
    %1 = vector.load %arg2[%c0_1, %c0_2] : memref<32x2xf32, #tpu.memory_space<vmem>>, vector<32x1xf32>
    %2 = vector.extract_strided_slice %0 {offsets = [0, 0], sizes = [1, 16], strides = [1, 1]} : vector<2x16xf32> to vector<1x16xf32>
    %3 = vector.broadcast %1 : vector<32x1xf32> to vector<32x16xf32>
    %4 = vector.broadcast %2 : vector<1x16xf32> to vector<32x16xf32>
    %5 = arith.mulf %3, %4 : vector<32x16xf32>
    %c0_3 = arith.constant 0 : index
    %c1 = arith.constant 1 : index
    %6 = vector.load %arg2[%c0_3, %c1] : memref<32x2xf32, #tpu.memory_space<vmem>>, vector<32x1xf32>
    %7 = vector.extract_strided_slice %0 {offsets = [1, 0], sizes = [1, 16], strides = [1, 1]} : vector<2x16xf32> to vector<1x16xf32>
    %8 = vector.broadcast %6 : vector<32x1xf32> to vector<32x16xf32>
    %9 = vector.broadcast %7 : vector<1x16xf32> to vector<32x16xf32>
    %10 = arith.mulf %8, %9 : vector<32x16xf32>
    %11 = arith.addf %5, %10 : vector<32x16xf32>
    %c0_4 = arith.constant 0 : index
    %c0_5 = arith.constant 0 : index
    %12 = vector.load %arg3[%c0_4, %c0_5] : memref<32x1xf32, #tpu.memory_space<vmem>>, vector<32x1xf32>
    %13 = vector.broadcast %12 : vector<32x1xf32> to vector<32x16xf32>
    %14 = arith.addf %11, %13 : vector<32x16xf32>
    %cst = arith.constant 0.00999999977 : f32
    %15 = vector.broadcast %cst : f32 to vector<32x16xf32>
    %16 = arith.mulf %15, %14 : vector<32x16xf32>
    %17 = arith.maximumf %14, %16 : vector<32x16xf32>
    %c0_6 = arith.constant 0 : index
    %c0_7 = arith.constant 0 : index
    %18 = vector.load %arg4[%c0_6, %c0_7] : memref<32x32xbf16, #tpu.memory_space<vmem>>, vector<32x32xbf16>
    %19 = arith.truncf %17 : vector<32x16xf32> to vector<32x16xbf16>
    %cst_8 = arith.constant dense<0.000000e+00> : vector<32x16xf32>
    %20 = tpu.matmul %18, %19, %cst_8 {dimension_numbers = #tpu.dot_dimension_numbers<[1], [0], [0], [1], [0, 0, 1, 1], [], []>} : vector<32x32xbf16>, vector<32x16xbf16>, vector<32x16xf32> -> vector<32x16xf32>
    %c0_9 = arith.constant 0 : index
    %c0_10 = arith.constant 0 : index
    %21 = vector.load %arg5[%c0_9, %c0_10] : memref<32x1xf32, #tpu.memory_space<vmem>>, vector<32x1xf32>
    %22 = vector.broadcast %21 : vector<32x1xf32> to vector<32x16xf32>
    %23 = arith.addf %20, %22 : vector<32x16xf32>
    %cst_11 = arith.constant 0.00999999977 : f32
    %24 = vector.broadcast %cst_11 : f32 to vector<32x16xf32>
    %25 = arith.mulf %24, %23 : vector<32x16xf32>
    %26 = arith.maximumf %23, %25 : vector<32x16xf32>
    %c0_12 = arith.constant 0 : index
    %c0_13 = arith.constant 0 : index
    %27 = vector.load %arg6[%c0_12, %c0_13] : memref<8x32xbf16, #tpu.memory_space<vmem>>, vector<8x32xbf16>
    %28 = arith.truncf %26 : vector<32x16xf32> to vector<32x16xbf16>
    %cst_14 = arith.constant dense<0.000000e+00> : vector<8x16xf32>
    %29 = tpu.matmul %27, %28, %cst_14 {dimension_numbers = #tpu.dot_dimension_numbers<[1], [0], [0], [1], [0, 0, 1, 1], [], []>} : vector<8x32xbf16>, vector<32x16xbf16>, vector<8x16xf32> -> vector<8x16xf32>
    %c0_15 = arith.constant 0 : index
    %c0_16 = arith.constant 0 : index
    %30 = vector.load %arg7[%c0_15, %c0_16] : memref<8x1xf32, #tpu.memory_space<vmem>>, vector<8x1xf32>
    %31 = vector.broadcast %30 : vector<8x1xf32> to vector<8x16xf32>
    %32 = arith.addf %29, %31 : vector<8x16xf32>
    %cst_17 = arith.constant 0.00999999977 : f32
    %33 = vector.broadcast %cst_17 : f32 to vector<8x16xf32>
    %34 = arith.mulf %33, %32 : vector<8x16xf32>
    %35 = arith.maximumf %32, %34 : vector<8x16xf32>
    %c0_18 = arith.constant 0 : index
    %c0_19 = arith.constant 0 : index
    %36 = vector.load %arg8[%c0_18, %c0_19] : memref<32x8xbf16, #tpu.memory_space<vmem>>, vector<32x8xbf16>
    %37 = arith.truncf %35 : vector<8x16xf32> to vector<8x16xbf16>
    %cst_20 = arith.constant dense<0.000000e+00> : vector<32x16xf32>
    %38 = tpu.matmul %36, %37, %cst_20 {dimension_numbers = #tpu.dot_dimension_numbers<[1], [0], [0], [1], [0, 0, 1, 1], [], []>} : vector<32x8xbf16>, vector<8x16xbf16>, vector<32x16xf32> -> vector<32x16xf32>
    %c0_21 = arith.constant 0 : index
    %c0_22 = arith.constant 0 : index
    %39 = vector.load %arg9[%c0_21, %c0_22] : memref<32x1xf32, #tpu.memory_space<vmem>>, vector<32x1xf32>
    %40 = vector.broadcast %39 : vector<32x1xf32> to vector<32x16xf32>
    %41 = arith.addf %38, %40 : vector<32x16xf32>
    %cst_23 = arith.constant 0.00999999977 : f32
    %42 = vector.broadcast %cst_23 : f32 to vector<32x16xf32>
    %43 = arith.mulf %42, %41 : vector<32x16xf32>
    %44 = arith.maximumf %41, %43 : vector<32x16xf32>
    %c0_24 = arith.constant 0 : index
    %c0_25 = arith.constant 0 : index
    %45 = vector.load %arg10[%c0_24, %c0_25] : memref<32x32xbf16, #tpu.memory_space<vmem>>, vector<32x32xbf16>
    %46 = arith.truncf %44 : vector<32x16xf32> to vector<32x16xbf16>
    %cst_26 = arith.constant dense<0.000000e+00> : vector<32x16xf32>
    %47 = tpu.matmul %45, %46, %cst_26 {dimension_numbers = #tpu.dot_dimension_numbers<[1], [0], [0], [1], [0, 0, 1, 1], [], []>} : vector<32x32xbf16>, vector<32x16xbf16>, vector<32x16xf32> -> vector<32x16xf32>
    %c0_27 = arith.constant 0 : index
    %c0_28 = arith.constant 0 : index
    %48 = vector.load %arg11[%c0_27, %c0_28] : memref<32x1xf32, #tpu.memory_space<vmem>>, vector<32x1xf32>
    %49 = vector.broadcast %48 : vector<32x1xf32> to vector<32x16xf32>
    %50 = arith.addf %47, %49 : vector<32x16xf32>
    %cst_29 = arith.constant 0.00999999977 : f32
    %51 = vector.broadcast %cst_29 : f32 to vector<32x16xf32>
    %52 = arith.mulf %51, %50 : vector<32x16xf32>
    %53 = arith.maximumf %50, %52 : vector<32x16xf32>
    %c0_30 = arith.constant 0 : index
    %c0_31 = arith.constant 0 : index
    %54 = vector.load %arg12[%c0_30, %c0_31] : memref<4x32xbf16, #tpu.memory_space<vmem>>, vector<4x32xbf16>
    %55 = arith.truncf %53 : vector<32x16xf32> to vector<32x16xbf16>
    %cst_32 = arith.constant dense<0.000000e+00> : vector<4x16xf32>
    %56 = tpu.matmul %54, %55, %cst_32 {dimension_numbers = #tpu.dot_dimension_numbers<[1], [0], [0], [1], [0, 0, 1, 1], [], []>} : vector<4x32xbf16>, vector<32x16xbf16>, vector<4x16xf32> -> vector<4x16xf32>
    %c0_33 = arith.constant 0 : index
    %c0_34 = arith.constant 0 : index
    %57 = vector.load %arg13[%c0_33, %c0_34] : memref<4x1xf32, #tpu.memory_space<vmem>>, vector<4x1xf32>
    %58 = vector.broadcast %57 : vector<4x1xf32> to vector<4x16xf32>
    %59 = arith.addf %56, %58 : vector<4x16xf32>
    %c0_35 = arith.constant 0 : index
    %c0_36 = arith.constant 0 : index
    %60 = vector.load %arg14[%c0_35, %c0_36] : memref<4x16xf32, #tpu.memory_space<vmem>>, vector<4x16xf32>
    tpu.vector_store %arg14[%c0_35, %c0_36], %59 {strides = array<i32>} : memref<4x16xf32, #tpu.memory_space<vmem>>, vector<4x16xf32>,
    return
  }
  func.func @transform_0(%arg0: i32) -> (i32, i32) {
    %c0_i32 = arith.constant 0 : i32
    %c0_i32_0 = arith.constant 0 : i32
    return %c0_i32, %arg0 : i32, i32
  }
  func.func @transform_1(%arg0: i32) -> (i32, i32) {
    %c0_i32 = arith.constant 0 : i32
    %c0_i32_0 = arith.constant 0 : i32
    %c0_i32_1 = arith.constant 0 : i32
    return %c0_i32, %c0_i32_0 : i32, i32
  }
  func.func @transform_2(%arg0: i32) -> (i32, i32) {
    %c0_i32 = arith.constant 0 : i32
    %c0_i32_0 = arith.constant 0 : i32
    %c0_i32_1 = arith.constant 0 : i32
    return %c0_i32, %c0_i32_0 : i32, i32
  }
  func.func @transform_3(%arg0: i32) -> (i32, i32) {
    %c0_i32 = arith.constant 0 : i32
    %c0_i32_0 = arith.constant 0 : i32
    %c0_i32_1 = arith.constant 0 : i32
    return %c0_i32, %c0_i32_0 : i32, i32
  }
  func.func @transform_4(%arg0: i32) -> (i32, i32) {
    %c0_i32 = arith.constant 0 : i32
    %c0_i32_0 = arith.constant 0 : i32
    %c0_i32_1 = arith.constant 0 : i32
    return %c0_i32, %c0_i32_0 : i32, i32
  }
  func.func @transform_5(%arg0: i32) -> (i32, i32) {
    %c0_i32 = arith.constant 0 : i32
    %c0_i32_0 = arith.constant 0 : i32
    %c0_i32_1 = arith.constant 0 : i32
    return %c0_i32, %c0_i32_0 : i32, i32
  }
  func.func @transform_6(%arg0: i32) -> (i32, i32) {
    %c0_i32 = arith.constant 0 : i32
    %c0_i32_0 = arith.constant 0 : i32
    %c0_i32_1 = arith.constant 0 : i32
    return %c0_i32, %c0_i32_0 : i32, i32
  }
  func.func @transform_7(%arg0: i32) -> (i32, i32) {
    %c0_i32 = arith.constant 0 : i32
    %c0_i32_0 = arith.constant 0 : i32
    %c0_i32_1 = arith.constant 0 : i32
    return %c0_i32, %c0_i32_0 : i32, i32
  }
  func.func @transform_8(%arg0: i32) -> (i32, i32) {
    %c0_i32 = arith.constant 0 : i32
    %c0_i32_0 = arith.constant 0 : i32
    %c0_i32_1 = arith.constant 0 : i32
    return %c0_i32, %c0_i32_0 : i32, i32
  }
  func.func @transform_9(%arg0: i32) -> (i32, i32) {
    %c0_i32 = arith.constant 0 : i32
    %c0_i32_0 = arith.constant 0 : i32
    %c0_i32_1 = arith.constant 0 : i32
    return %c0_i32, %c0_i32_0 : i32, i32
  }
  func.func @transform_10(%arg0: i32) -> (i32, i32) {
    %c0_i32 = arith.constant 0 : i32
    %c0_i32_0 = arith.constant 0 : i32
    %c0_i32_1 = arith.constant 0 : i32
    return %c0_i32, %c0_i32_0 : i32, i32
  }
  func.func @transform_11(%arg0: i32) -> (i32, i32) {
    %c0_i32 = arith.constant 0 : i32
    %c0_i32_0 = arith.constant 0 : i32
    %c0_i32_1 = arith.constant 0 : i32
    return %c0_i32, %c0_i32_0 : i32, i32
  }
  func.func @transform_12(%arg0: i32) -> (i32, i32) {
    %c0_i32 = arith.constant 0 : i32
    %c0_i32_0 = arith.constant 0 : i32
    %c0_i32_1 = arith.constant 0 : i32
    return %c0_i32, %c0_i32_0 : i32, i32
  }
  func.func @transform_13(%arg0: i32) -> (i32, i32) {
    %c0_i32 = arith.constant 0 : i32
    %c0_i32_0 = arith.constant 0 : i32
    return %c0_i32, %arg0 : i32, i32
  }
}

</mosaic_0001>

<bundles_post_ra>
// kernel: autoencoder_breast_v0_3_forward.1
= control target key start
LH: loop header
LB: loop body
LE: loop exit
PB: predicated region body
PF: predicated region fallthrough
CT: control target
= control target key end

     0   :  { %v463_v0 = vmov 1   ;;  %v464_v3 = vmov 0   ;;  %vm176_vm0 = vcmask 261120   ;;  %vm283_vm1 = vcmask 1043456   ;;  %s637_s1 = inlined_call_operand.vmem [shape: f32[32,2], index: 1, kind: input, shape index: {}]   ;;  %s638_s2 = inlined_call_operand.vmem [shape: f32[32,1], index: 2, kind: input, shape index: {}]   ;;  %s639_s4 = inlined_call_operand.vmem [shape: f32[32,1], index: 4, kind: input, shape index: {}]   ;;  %s640_s6 = inlined_call_operand.vmem [shape: f32[8,1], index: 6, kind: input, shape index: {}]   ;;  %s641_s8 = inlined_call_operand.vmem [shape: f32[32,1], index: 8, kind: input, shape index: {}]   ;;  %s642_s10 = inlined_call_operand.vmem [shape: f32[32,1], index: 10, kind: input, shape index: {}]   ;;  %s643_s12 = inlined_call_operand.vmem [shape: f32[4,1], index: 12, kind: input, shape index: {}]   ;;  %s644_s0 = inlined_call_operand.vmem [shape: f32[2,16], index: 0, kind: input, shape index: {}]   ;;  %s645_s3 = inlined_call_operand.vmem [shape: bf16[32,32], index: 3, kind: input, shape index: {}]   ;;  %s646_s5 = inlined_call_operand.vmem [shape: bf16[8,32], index: 5, kind: input, shape index: {}]   ;;  %s647_s7 = inlined_call_operand.vmem [shape: bf16[32,8], index: 7, kind: input, shape index: {}]   ;;  %s648_s9 = inlined_call_operand.vmem [shape: bf16[32,32], index: 9, kind: input, shape index: {}]   ;;  %s649_s11 = inlined_call_operand.vmem [shape: bf16[4,32], index: 11, kind: input, shape index: {}]   ;;  %s650_s13 = inlined_call_operand.vmem [shape: f32[4,16], index: 13, kind: output, shape index: {}]  }
   0x1   :  { %460 = vset.pattern.permute.xlu0 %v463_v0  ;;  %458 = vset.pattern.permute.xlu1 %v463_v0  ;;  %v48_v1 = vld [vmem:[%s637_s1 + $0x10] sm:$0xff]  ;;  %v46_v2 = vld [vmem:[%s637_s1] sm:$0xff]  ;;  %v49_v4 = vld [vmem:[%s637_s1 + $0x18] sm:$0xff]  ;;  %vm276_vm2 = vcmask 64512   ;;  %vm412_vm3 = vcmask 125952  }
   0x2   :  { %459 = vset.pattern.permute.xlu2 %v464_v3  ;;  %84 = vperm.xlu1 %458, %v48_v1   ;;  %v47_v5 = vld [vmem:[%s637_s1 + $0x8] sm:$0xff]  ;;  %v102_v6 = vld [vmem:[%s638_s2 + $0x10] sm:$0xff]  ;;  %v100_v7 = vld [vmem:[%s638_s2] sm:$0xff] }
   0x3   :  { %76 = vperm.xlu0 %460, %v46_v2   ;;  %52 = vperm.xlu2 %459, %v46_v2   ;;  %v103_v8 = vld [vmem:[%s638_s2 + $0x18] sm:$0xff]  ;;  %v101_v9 = vld [vmem:[%s638_s2 + $0x8] sm:$0xff]  ;;  %v144_v11 = vld [vmem:[%s639_s4 + $0x10] sm:$0xff] }
   0x4   :  { %v145_v10 = vld [vmem:[%s639_s4 + $0x18] sm:$0xff]  ;;  %v213_v12 = vld [vmem:[%s640_s6] sm:$0xff]  ;;  %v143_v13 = vld [vmem:[%s639_s4 + $0x8] sm:$0xff] }
   0x5   :  { %v142_v14 = vld [vmem:[%s639_s4] sm:$0xff]  ;;  %v245_v16 = vld [vmem:[%s641_s8 + $0x18] sm:$0xff]  ;;  %v244_v17 = vld [vmem:[%s641_s8 + $0x10] sm:$0xff] }
   0x6   :  { %v242_v15 = vld [vmem:[%s641_s8] sm:$0xff]  ;;  %v323_v18 = vld [vmem:[%s642_s10 + $0x18] sm:$0xff]  ;;  %v322_v19 = vld [vmem:[%s642_s10 + $0x10] sm:$0xff] }
   0x7   :  { %v243_v20 = vld [vmem:[%s641_s8 + $0x8] sm:$0xff]  ;;  %v390_v21 = vld [vmem:[%s643_s12] sm:$0xf] }
   0x8   :  { %v321_v22 = vld [vmem:[%s642_s10 + $0x8] sm:$0xff]  ;;  %v320_v23 = vld [vmem:[%s642_s10] sm:$0xff] }
   0x9   :  { %v45_v29 = vld [vmem:[%s644_s0] sm:$0x3]  ;;  %v451_v2 = vld [vmem:[%s645_s3 + $0x8] sm:$0xff] }
   0xa   :  { %88 = vperm.xlu1 %458, %v49_v4   ;;  %v70_v31 = vperm.slane %v45_v29, 0  ;;  %v91_v32 = vperm.slane %v45_v29, 1 }
   0xb   :  { %461 = vset.pattern.permute.xlu0 %v464_v3  ;;  %57 = vperm.xlu2 %459, %v47_v5  }
   0xc   :  { %62 = vperm.xlu0 %461, %v48_v1   ;;  %v450_v1 = vld [vmem:[%s645_s3] sm:$0xff] }
  0x12   :  { %80 = vperm.xlu1 %458, %v47_v5  }
  0x13   :  { %116 = vperm.xlu2 %459, %v102_v6  }
  0x14   :  { %67 = vperm.xlu0 %461, %v49_v4  }
  0x1a   :  { %462 = vset.pattern.permute.xlu1 %v464_v3 }
  0x1b   :  { %106 = vperm.xlu2 %459, %v100_v7   ;;  %121 = vperm.xlu1 %462, %v103_v8  }
  0x1c   :  { %111 = vperm.xlu0 %461, %v101_v9  }
  0x23   :  { %163 = vperm.xlu2 %459, %v145_v10   ;;  %158 = vperm.xlu1 %462, %v144_v11  }
  0x24   :  { %216 = vperm.xlu0 %461, %v213_v12  }
  0x2b   :  { %153 = vperm.xlu2 %459, %v143_v13   ;;  %148 = vperm.xlu1 %462, %v142_v14  }
  0x2c   :  { %248 = vperm.xlu0 %461, %v242_v15  }
  0x33   :  { %263 = vperm.xlu2 %459, %v245_v16   ;;  %258 = vperm.xlu1 %462, %v244_v17  }
  0x34   :  { %341 = vperm.xlu0 %461, %v323_v18  }
  0x3b   :  { %336 = vperm.xlu2 %459, %v322_v19   ;;  %253 = vperm.xlu1 %462, %v243_v20  }
  0x3c   :  { %393 = vperm.xlu0 %461, %v390_v21  }
  0x43   :  { %331 = vperm.xlu2 %459, %v321_v22   ;;  %326 = vperm.xlu1 %462, %v320_v23  }
  0x5d   :  { %v53_v24 = vpop.permute.xlu2 %52 }
  0x5e   :  { %v71_v37 = vmul.f32 %v70_v31, %v53_v24 }
  0x65   :  { %v58_v27 = vpop.permute.xlu2 %57 }
  0x66   :  { %v72_v46 = vmul.f32 %v70_v31, %v58_v27 }
  0x6d   :  { %v117_v34 = vpop.permute.xlu2 %116 }
  0x74   :  { %v85_v25 = vpop.permute.xlu1 %84 }
  0x75   :  { %v77_v26 = vpop.permute.xlu0 %76  ;;  %v94_v35 = vmul.f32 %v91_v32, %v85_v25  ;;  %v107_v48 = vpop.permute.xlu2 %106  ;;  %v210_v25 = vld [vmem:[%s646_s5] sm:$0xf] }
  0x76   :  { %v92_v38 = vmul.f32 %v91_v32, %v77_v26 }
  0x78   :  { %v96_v43 = vadd.f32 %v92_v38, %v71_v37 }
  0x7a   :  { %v124_v51 = vadd.f32 %v107_v48, %v96_v43 }
  0x7c   :  { %v89_v28 = vpop.permute.xlu1 %88  ;;  %v128_v58 = vmul.f32 0.01, %v124_v51 }
  0x7d   :  { %v95_v44 = vmul.f32 %v91_v32, %v89_v28  ;;  %v164_v5 = vpop.permute.xlu2 %163 }
  0x7e   :  { %v63_v30 = vpop.permute.xlu0 %62  ;;  %v132_v63 = vmax.f32 %v124_v51, %v128_v58  ;;  %v454_v58 = vld [vmem:[%s648_s9] sm:$0xff] }
  0x7f   :  { %v73_v33 = vmul.f32 %v70_v31, %v63_v30 }
  0x81   :  { %v98_v39 = vadd.f32 %v94_v35, %v73_v33  ;;  %v453_v35 = vld [vmem:[%s647_s7 + $0x8] sm:$0xff] }
  0x83   :  { %v126_v45 = vadd.f32 %v117_v34, %v98_v39  ;;  %v452_v34 = vld [vmem:[%s647_s7] sm:$0xff] }
  0x84   :  { %v81_v36 = vpop.permute.xlu1 %80 }
  0x85   :  { %v93_v42 = vmul.f32 %v91_v32, %v81_v36  ;;  %v130_v54 = vmul.f32 0.01, %v126_v45  ;;  %v154_v9 = vpop.permute.xlu2 %153 }
  0x86   :  { %v68_v40 = vpop.permute.xlu0 %67 }
  0x87   :  { %v74_v41 = vmul.f32 %v70_v31, %v68_v40  ;;  %v97_v50 = vadd.f32 %v93_v42, %v72_v46  ;;  %v134_v59 = vmax.f32 %v126_v45, %v130_v54 }
  0x89   :  { %v99_v47 = vadd.f32 %v95_v44, %v74_v41 }
  0x8d   :  { %v122_v49 = vpop.permute.xlu1 %121  ;;  %v264_v42 = vpop.permute.xlu2 %263 }
  0x8e   :  { %v127_v52 = vadd.f32 %v122_v49, %v99_v47  ;;  %v112_v53 = vpop.permute.xlu0 %111 }
  0x8f   :  { %v125_v55 = vadd.f32 %v112_v53, %v97_v50 }
  0x90   :  { %v131_v56 = vmul.f32 0.01, %v127_v52 }
  0x91   :  { %v129_v57 = vmul.f32 0.01, %v125_v55 }
  0x92   :  { %v135_v60 = vmax.f32 %v127_v52, %v131_v56 }
  0x93   :  { %v133_v61 = vmax.f32 %v125_v55, %v129_v57 }
  0x94   :  { %v141_v62 = vpack.c.bf16 %v135_v60, %v134_v59  ;;  %v455_v59 = vld [vmem:[%s648_s9 + $0x8] sm:$0xff] }
  0x95   :  { %v140_v0 = vpack.c.bf16 %v133_v61, %v132_v63  ;;  %v159_v6 = vpop.permute.xlu1 %158 }
  0x96   :  { %189 = vmatpush.bf16.msra.mxu0 %v141_v62  ;;  %v217_v26 = vpop.permute.xlu0 %216  ;;  %v337_v62 = vpop.permute.xlu2 %336 }
  0x9a   :  { %190 = vmatpush.bf16.msra.mxu0 %v140_v0 }
  0x9d   :  { %426 = vmatmul.msk.bf16.vlgmr.msra.gmra.mxu0 %vm176_vm0, %v450_v1  ;;  %v149_v11 = vpop.permute.xlu1 %148 }
  0x9e   :  { %v249_v44 = vpop.permute.xlu0 %248  ;;  %v332_v1 = vpop.permute.xlu2 %331 }
  0xa5   :  { %v259_v38 = vpop.permute.xlu1 %258 }
  0xad   :  { %427 = vmatmul.msk.bf16.gmra.mxu0 %vm176_vm0, %v451_v2  ;;  %v254_v41 = vpop.permute.xlu1 %253  ;;  %v342_v2 = vpop.permute.xlu0 %341 }
 0x11a   :  { %v192_v3 = vpop.f32.mrf.mxu0 }
 0x11b   :  { %v193_v13 = vadd.f32 %v192_v3, %v149_v11 }
 0x11d   :  { %v202_v18 = vmul.f32 0.01, %v193_v13 }
 0x11f   :  { %v206_v23 = vmax.f32 %v193_v13, %v202_v18  ;;  %v387_v18 = vld [vmem:[%s649_s11] sm:$0x3] }
 0x122   :  { %v194_v4 = vpop.f32.mrf.mxu0 }
 0x123   :  { %v195_v10 = vadd.f32 %v194_v4, %v154_v9  ;;  %v327_v4 = vpop.permute.xlu1 %326 }
 0x125   :  { %v203_v16 = vmul.f32 0.01, %v195_v10 }
 0x127   :  { %v207_v21 = vmax.f32 %v195_v10, %v203_v16 }
 0x129   :  { %v211_v24 = vpack.c.bf16 %v207_v21, %v206_v23 }
 0x12a   :  { %v197_v7 = vpop.f32.mrf.mxu0 }
 0x12b   :  { %v198_v8 = vadd.f32 %v197_v7, %v159_v6 }
 0x12d   :  { %v204_v14 = vmul.f32 0.01, %v198_v8 }
 0x12f   :  { %v208_v19 = vmax.f32 %v198_v8, %v204_v14 }
 0x132   :  { %v199_v12 = vpop.f32.mrf.mxu0 }
 0x133   :  { %v200_v15 = vadd.f32 %v199_v12, %v164_v5 }
 0x135   :  { %v205_v17 = vmul.f32 0.01, %v200_v15 }
 0x137   :  { %v209_v20 = vmax.f32 %v200_v15, %v205_v17 }
 0x139   :  { %v212_v22 = vpack.c.bf16 %v209_v20, %v208_v19  ;;  %v394_v19 = vpop.permute.xlu0 %393 }
 0x13b   :  { %228 = vmatpush.bf16.msra.mxu1 %v212_v22 }
 0x13f   :  { %229 = vmatpush.bf16.msra.mxu1 %v211_v24 }
 0x142   :  { %428 = vmatmul.msk.bf16.vlgmr.msra.gmra.mxu1 %vm176_vm0, %v210_v25 }
 0x1bf   :  { %v231_v27 = vpop.f32.mrf.mxu1 }
 0x1c0   :  { %v232_v28 = vadd.f32 %v231_v27, %v217_v26 }
 0x1c2   :  { %v235_v29 = vmul.f32 0.01, %v232_v28 }
 0x1c4   :  { %v236_v30 = vmax.f32 %v232_v28, %v235_v29 }
 0x1c6   :  { %v241_v31 = vpack.c.bf16 %v236_v30, %v236_v30 }
 0x1c7   :  { %v233_v32 = vpop.f32.mrf.mxu1 }
 0x1c8   :  { %v285_v33 = vsel %vm283_vm1, %v241_v31, 0 }
 0x1c9   :  { %294 = vmatpush.bf16.msra.mxu2 %v285_v33 }
 0x1cc   :  { %437 = vmatmul.msk.bf16.vlgmr.msra.gmra.mxu2 %vm276_vm2, %v452_v34 }
 0x1dc   :  { %438 = vmatmul.msk.bf16.gmra.mxu2 %vm276_vm2, %v453_v35 }
 0x24f   :  { %v296_v36 = vpop.f32.mrf.mxu2 }
 0x250   :  { %v297_v46 = vadd.f32 %v296_v36, %v249_v44 }
 0x252   :  { %v306_v51 = vmul.f32 0.01, %v297_v46 }
 0x254   :  { %v310_v56 = vmax.f32 %v297_v46, %v306_v51 }
 0x257   :  { %v298_v37 = vpop.f32.mrf.mxu2 }
 0x258   :  { %v299_v43 = vadd.f32 %v298_v37, %v254_v41 }
 0x25a   :  { %v307_v49 = vmul.f32 0.01, %v299_v43 }
 0x25c   :  { %v311_v54 = vmax.f32 %v299_v43, %v307_v49 }
 0x25e   :  { %v318_v57 = vpack.c.bf16 %v311_v54, %v310_v56 }
 0x25f   :  { %v301_v39 = vpop.f32.mrf.mxu2 }
 0x260   :  { %v302_v40 = vadd.f32 %v301_v39, %v259_v38 }
 0x262   :  { %v308_v47 = vmul.f32 0.01, %v302_v40 }
 0x264   :  { %v312_v52 = vmax.f32 %v302_v40, %v308_v47 }
 0x267   :  { %v303_v45 = vpop.f32.mrf.mxu2 }
 0x268   :  { %v304_v48 = vadd.f32 %v303_v45, %v264_v42 }
 0x26a   :  { %v309_v50 = vmul.f32 0.01, %v304_v48 }
 0x26c   :  { %v313_v53 = vmax.f32 %v304_v48, %v309_v50 }
 0x26e   :  { %v319_v55 = vpack.c.bf16 %v313_v53, %v312_v52 }
 0x270   :  { %366 = vmatpush.bf16.msra.mxu3 %v319_v55 }
 0x274   :  { %367 = vmatpush.bf16.msra.mxu3 %v318_v57 }
 0x277   :  { %447 = vmatmul.msk.bf16.vlgmr.msra.gmra.mxu3 %vm176_vm0, %v454_v58 }
 0x287   :  { %448 = vmatmul.msk.bf16.gmra.mxu3 %vm176_vm0, %v455_v59 }
 0x2fa   :  { %v369_v60 = vpop.f32.mrf.mxu3 }
 0x2fb   :  { %v370_v6 = vadd.f32 %v369_v60, %v327_v4 }
 0x2fd   :  { %v379_v11 = vmul.f32 0.01, %v370_v6 }
 0x2ff   :  { %v383_v16 = vmax.f32 %v370_v6, %v379_v11 }
 0x302   :  { %v371_v61 = vpop.f32.mrf.mxu3 }
 0x303   :  { %v372_v3 = vadd.f32 %v371_v61, %v332_v1 }
 0x305   :  { %v380_v9 = vmul.f32 0.01, %v372_v3 }
 0x307   :  { %v384_v14 = vmax.f32 %v372_v3, %v380_v9 }
 0x309   :  { %v388_v17 = vpack.c.bf16 %v384_v14, %v383_v16 }
 0x30a   :  { %v374_v63 = vpop.f32.mrf.mxu3 }
 0x30b   :  { %v375_v0 = vadd.f32 %v374_v63, %v337_v62 }
 0x30d   :  { %v381_v7 = vmul.f32 0.01, %v375_v0 }
 0x30f   :  { %v385_v12 = vmax.f32 %v375_v0, %v381_v7 }
 0x312   :  { %v376_v5 = vpop.f32.mrf.mxu3 }
 0x313   :  { %v377_v8 = vadd.f32 %v376_v5, %v342_v2 }
 0x315   :  { %v382_v10 = vmul.f32 0.01, %v377_v8 }
 0x317   :  { %v386_v13 = vmax.f32 %v377_v8, %v382_v10 }
 0x319   :  { %v389_v15 = vpack.c.bf16 %v386_v13, %v385_v12 }
 0x31b   :  { %405 = vmatpush.bf16.msrb.mxu1 %v389_v15 }
 0x31f   :  { %406 = vmatpush.bf16.msrb.mxu1 %v388_v17 }
 0x322   :  { %449 = vmatmul.msk.bf16.vlgmr.msrb.gmra.mxu1 %vm176_vm0, %v387_v18 }
 0x39f   :  { %v408_v20 = vpop.f32.mrf.mxu1 }
 0x3a0   :  { %v409_v21 = vadd.f32 %v408_v20, %v394_v19 }
 0x3a2   :  { %413 = vst.msk [vmem:[%s650_s13] sm:$0xf] %vm412_vm3, %v409_v21 }
 0x3a7   :  { %v410_v22 = vpop.f32.mrf.mxu1 }

</bundles_post_ra>
